<compile_context>
chip_gen: v6e
topology: v6e:2x2x1
jax: 0.10.0
libtpu: 0.0.40
codegen_flags: <defaults>
</compile_context>

<pallas_src>
import functools

import jax
import jax.numpy as jnp
from jax.experimental import pallas as pl
from jax.experimental.pallas import tpu as pltpu

_LANE = 128
_BF16 = jnp.bfloat16


def _round_up(n, m):
    return ((n + m - 1) // m) * m


def _pad2(a, rows, cols, dtype=None):
    """Zero-pad a 2-D array to (rows, cols) and cast."""
    dtype = a.dtype if dtype is None else dtype
    out = jnp.zeros((rows, cols), dtype)
    return out.at[: a.shape[0], : a.shape[1]].set(a.astype(dtype))


def _tile(n, cap):
    """Largest multiple of 128 that is <= cap and divides n (n % 128 == 0)."""
    t = min(cap, n)
    while n % t:
        t -= _LANE
    return t


def _vmem_limit(buffer_bytes):
    """Explicit scoped-VMEM limit: footprint + headroom, <= 3/4 physical VMEM."""
    try:
        cap = int(pltpu.get_tpu_info().vmem_capacity_bytes)
    except Exception:  # interpret mode / unknown chip
        cap = 64 << 20
    want = int(1.5 * buffer_bytes) + (8 << 20)
    return int(min(max(want, 32 << 20), (cap * 3) // 4))


# --- single-buffering of grid-invariant inputs (with graceful fallback) -----
_SINGLE_BUFFER = [True]


def _invariant_spec(block_shape, index_map):
    """BlockSpec for a block whose index_map is constant across the grid."""
    if _SINGLE_BUFFER[0]:
        return pl.BlockSpec(block_shape, index_map, pipeline_mode=pl.Buffered(1))
    return pl.BlockSpec(block_shape, index_map)


def _with_buffering_fallback(run):
    try:
        return run()
    except Exception:
        if not _SINGLE_BUFFER[0]:
            raise
        _SINGLE_BUFFER[0] = False  # retry with default double buffering
        return run()


# ---------------------------------------------------------------------------
# Kernels
# ---------------------------------------------------------------------------
def _gcn_layer_kernel(adj_ref, h_ref, w_ref, b_ref, out_ref, acc_ref, hw_ref,
                      *, tk):
    """GCNConv row panel: acc += A[i,k] @ (h[k] @ W); ReLU(acc + b) at last k."""
    i = pl.program_id(0)
    k = pl.program_id(1)
    row0 = pl.multiple_of(k * tk, tk)

    # h @ W computed panel-by-panel during the first row sweep, kept in VMEM.
    @pl.when(i == 0)
    def _compute_hw_panel():
        hw = jnp.dot(h_ref[pl.ds(row0, tk), :], w_ref[...],
                     preferred_element_type=jnp.float32)
        hw_ref[pl.ds(row0, tk), :] = hw.astype(hw_ref.dtype)

    @pl.when(k == 0)
    def _init():
        acc_ref[...] = jnp.zeros_like(acc_ref)

    acc_ref[...] += jnp.dot(adj_ref[...], hw_ref[pl.ds(row0, tk), :],
                            preferred_element_type=jnp.float32)

    @pl.when(k == pl.num_programs(1) - 1)
    def _finalize():
        out_ref[...] = jnp.maximum(acc_ref[...] + b_ref[...],
                                   0.0).astype(out_ref.dtype)
        # TODO(synk): BatchNorm branch omitted (use_batch_norm=False config).


def _gcn_head_kernel(adj_ref, h_ref, w_ref, b_ref, eps_ref, z_ref, zt_ref,
                     acc_ref, hw_ref, *, tk, d_pad):
    """Fused mu/logstd GCN head + reparameterization; emits z and z^T."""
    i = pl.program_id(0)
    k = pl.program_id(1)
    row0 = pl.multiple_of(k * tk, tk)

    @pl.when(i == 0)
    def _compute_hw_panel():
        hw = jnp.dot(h_ref[pl.ds(row0, tk), :], w_ref[...],
                     preferred_element_type=jnp.float32)
        hw_ref[pl.ds(row0, tk), :] = hw.astype(hw_ref.dtype)

    @pl.when(k == 0)
    def _init():
        acc_ref[...] = jnp.zeros_like(acc_ref)

    acc_ref[...] += jnp.dot(adj_ref[...], hw_ref[pl.ds(row0, tk), :],
                            preferred_element_type=jnp.float32)

    @pl.when(k == pl.num_programs(1) - 1)
    def _finalize():
        head = acc_ref[...] + b_ref[...]           # f32
        mu = head[:, :d_pad]
        logstd = head[:, d_pad:]
        # Reparameterization kept in f32 (exp / variance path).
        z = mu + eps_ref[...] * jnp.exp(logstd)
        z_ref[...] = z.astype(z_ref.dtype)
        zt_ref[...] = z.T.astype(zt_ref.dtype)     # one-time transpose per panel


def _decoder_kernel(z_ref, zt_ref, o_ref):
    """Inner-product decoder tile: sigmoid(z_i @ z^T_j)."""
    logits = jnp.dot(z_ref[...], zt_ref[...], preferred_element_type=jnp.float32)
    # Single EUP transcendental; adds/muls ride the under-used VPU slots.
    o_ref[...] = (0.5 * jnp.tanh(0.5 * logits) + 0.5).astype(o_ref.dtype)


# ---------------------------------------------------------------------------
# pallas_call wrappers
# ---------------------------------------------------------------------------
def _gcn_layer(adj_b, h_b, w_b, b_f32, *, row_tile=256, col_tile=512):
    n_pad = adj_b.shape[0]
    f_pad = h_b.shape[1]
    o_pad = w_b.shape[1]
    tm = _tile(n_pad, row_tile)
    tk = _tile(n_pad, col_tile)
    grid = (n_pad // tm, n_pad // tk)

    buf_bytes = (2 * tm * tk * 2            # adj tiles (double buffered)
                 + 2 * n_pad * f_pad * 2    # h (worst case, 2 buffers)
                 + 2 * f_pad * o_pad * 2    # W
                 + 2 * 8 * o_pad * 4        # bias
                 + 2 * tm * o_pad * 2       # out tiles
                 + tm * o_pad * 4           # acc scratch
                 + n_pad * o_pad * 2)       # hw scratch

    kernel = functools.partial(_gcn_layer_kernel, tk=tk)

    def run():
        return pl.pallas_call(
            kernel,
            out_shape=jax.ShapeDtypeStruct((n_pad, o_pad), _BF16),
            grid_spec=pltpu.PrefetchScalarGridSpec(
                num_scalar_prefetch=0,
                grid=grid,
                in_specs=[
                    pl.BlockSpec((tm, tk), lambda i, k: (i, k)),            # adj
                    _invariant_spec((n_pad, f_pad), lambda i, k: (0, 0)),   # h
                    _invariant_spec((f_pad, o_pad), lambda i, k: (0, 0)),   # W
                    _invariant_spec((1, o_pad), lambda i, k: (0, 0)),       # b
                ],
                out_specs=pl.BlockSpec((tm, o_pad), lambda i, k: (i, 0)),
                scratch_shapes=[pltpu.VMEM((tm, o_pad), jnp.float32),
                                pltpu.VMEM((n_pad, o_pad), _BF16)],
            ),
            compiler_params=pltpu.CompilerParams(
                # k is the adj-column reduction; i reuses the hw scratch filled
                # during the first row sweep, so both axes stay sequential.
                dimension_semantics=("arbitrary", "arbitrary"),
                vmem_limit_bytes=_vmem_limit(buf_bytes)),
        )(adj_b, h_b, w_b, b_f32)

    return _with_buffering_fallback(run)


def _gcn_head(adj_b, h_b, wh_b, bh_f32, eps_f32, d_pad, *,
              row_tile=256, col_tile=512):
    n_pad = adj_b.shape[0]
    f_pad = h_b.shape[1]
    o_pad = wh_b.shape[1]          # 2 * d_pad  ([W_mu | W_logstd])
    tm = _tile(n_pad, row_tile)
    tk = _tile(n_pad, col_tile)
    grid = (n_pad // tm, n_pad // tk)

    buf_bytes = (2 * tm * tk * 2 + 2 * n_pad * f_pad * 2 + 2 * f_pad * o_pad * 2
                 + 2 * 8 * o_pad * 4 + 2 * tm * d_pad * 4       # eps tiles
                 + 4 * tm * d_pad * 2                           # z / z^T tiles
                 + tm * o_pad * 4 + n_pad * o_pad * 2)

    kernel = functools.partial(_gcn_head_kernel, tk=tk, d_pad=d_pad)

    def run():
        return pl.pallas_call(
            kernel,
            out_shape=(jax.ShapeDtypeStruct((n_pad, d_pad), _BF16),
                       jax.ShapeDtypeStruct((d_pad, n_pad), _BF16)),
            grid_spec=pltpu.PrefetchScalarGridSpec(
                num_scalar_prefetch=0,
                grid=grid,
                in_specs=[
                    pl.BlockSpec((tm, tk), lambda i, k: (i, k)),            # adj
                    _invariant_spec((n_pad, f_pad), lambda i, k: (0, 0)),   # h
                    _invariant_spec((f_pad, o_pad), lambda i, k: (0, 0)),   # W head
                    _invariant_spec((1, o_pad), lambda i, k: (0, 0)),       # b head
                    pl.BlockSpec((tm, d_pad), lambda i, k: (i, 0)),         # eps
                ],
                out_specs=(pl.BlockSpec((tm, d_pad), lambda i, k: (i, 0)),  # z
                           pl.BlockSpec((d_pad, tm), lambda i, k: (0, i))), # z^T
                scratch_shapes=[pltpu.VMEM((tm, o_pad), jnp.float32),
                                pltpu.VMEM((n_pad, o_pad), _BF16)],
            ),
            compiler_params=pltpu.CompilerParams(
                dimension_semantics=("arbitrary", "arbitrary"),
                vmem_limit_bytes=_vmem_limit(buf_bytes)),
        )(adj_b, h_b, wh_b, bh_f32, eps_f32)

    return _with_buffering_fallback(run)


def _inner_product_decoder(z_b, zt_b, out_dtype, *, row_tile=256, col_tile=512):
    n_pad, d_pad = z_b.shape
    tm = _tile(n_pad, row_tile)
    tn = _tile(n_pad, col_tile)
    grid = (n_pad // tm, n_pad // tn)

    osz = jnp.dtype(out_dtype).itemsize
    buf_bytes = 2 * tm * d_pad * 2 + 2 * d_pad * tn * 2 + 2 * tm * tn * osz

    return pl.pallas_call(
        _decoder_kernel,
        out_shape=jax.ShapeDtypeStruct((n_pad, n_pad), out_dtype),
        grid_spec=pltpu.PrefetchScalarGridSpec(
            num_scalar_prefetch=0,
            grid=grid,
            in_specs=[
                pl.BlockSpec((tm, d_pad), lambda i, j: (i, 0)),   # z rows
                pl.BlockSpec((d_pad, tn), lambda i, j: (0, j)),   # z^T cols
            ],
            out_specs=pl.BlockSpec((tm, tn), lambda i, j: (i, j)),
        ),
        compiler_params=pltpu.CompilerParams(
            # Output tiles are independent: both axes parallel (2 TCs on v7x).
            dimension_semantics=("parallel", "parallel"),
            vmem_limit_bytes=_vmem_limit(buf_bytes)),
    )(z_b, zt_b)


# ---------------------------------------------------------------------------
# Forward pass
# ---------------------------------------------------------------------------
def graph_model_forward(params, adj_hat, x, eps, out_dtype=jnp.float32):
    """VGAE forward: adj_pred = sigmoid(z z^T), z = mu + eps*exp(logstd)."""
    n = x.shape[0]
    d_lat = params["mu"][0].shape[1]
    n_pad = _round_up(n, _LANE)
    d_pad = _round_up(d_lat, _LANE)

    adj_b = _pad2(adj_hat, n_pad, n_pad, _BF16)

    # GCN conv stack — each layer keeps its own padded weight shape.
    h = _pad2(x, n_pad, _round_up(x.shape[1], _LANE), _BF16)
    for (w, b) in params["convs"]:
        fi_pad = _round_up(w.shape[0], _LANE)
        fo_pad = _round_up(w.shape[1], _LANE)
        h = _gcn_layer(adj_b, h, _pad2(w, fi_pad, fo_pad, _BF16),
                       _pad2(b, 1, fo_pad, jnp.float32))

    # Fused mu/logstd head + reparameterization (single X@W and adj@(XW)).
    w_mu, b_mu = params["mu"]
    w_ls, b_ls = params["logstd"]
    hid_pad = _round_up(w_mu.shape[0], _LANE)
    wh = jnp.concatenate([_pad2(w_mu, hid_pad, d_pad, _BF16),
                          _pad2(w_ls, hid_pad, d_pad, _BF16)], axis=1)
    bh = jnp.concatenate([_pad2(b_mu, 1, d_pad, jnp.float32),
                          _pad2(b_ls, 1, d_pad, jnp.float32)], axis=1)
    eps_p = _pad2(eps, n_pad, d_pad, jnp.float32)
    z, zt = _gcn_head(adj_b, h, wh, bh, eps_p, d_pad)

    # Inner-product decoder.
    # TODO(synk): for training, emit logits / fuse the BCE+KL loss reduction
    # in-kernel instead of writing the dense N x N probability matrix to HBM.
    adj_pred = _inner_product_decoder(z, zt, out_dtype)
    return adj_pred[:n, :n]


# ---------------------------------------------------------------------------
# Glue: adjacency normalization, params, pure-JAX references
# ---------------------------------------------------------------------------
def gcn_norm_adj(edge_index, n):
    """D^-1/2 (A + I) D^-1/2 from a [2, E] edge_index (PyG GCNConv default)."""
    a = jnp.zeros((n, n), jnp.float32).at[edge_index[0], edge_index[1]].set(1.0)
    a = a + jnp.eye(n, dtype=jnp.float32)
    deg = a.sum(axis=1)
    dinv = jnp.where(deg > 0, 1.0 / jnp.sqrt(deg), 0.0)
    return dinv[:, None] * a * dinv[None, :]


def glorot(key, fan_in, fan_out):
    lim = jnp.sqrt(6.0 / (fan_in + fan_out))
    return jax.random.uniform(key, (fan_in, fan_out), jnp.float32, -lim, lim)


def init_params(key, num_features, hidden, out, num_layers):
    keys = jax.random.split(key, num_layers + 2)
    convs = []
    f_in = num_features
    for i in range(num_layers):
        convs.append((glorot(keys[i], f_in, hidden),
                      jnp.zeros((1, hidden), jnp.float32)))
        f_in = hidden
    mu = (glorot(keys[num_layers], hidden, out), jnp.zeros((1, out), jnp.float32))
    logstd = (glorot(keys[num_layers + 1], hidden, out),
              jnp.zeros((1, out), jnp.float32))
    return {"convs": convs, "mu": mu, "logstd": logstd}


def graph_model_forward_ref_f32(params, adj_hat, x, eps):
    """Pure-f32 JAX reference."""
    h = x
    for (w, b) in params["convs"]:
        h = jnp.maximum(adj_hat @ (h @ w) + b, 0.0)
    mu = adj_hat @ (h @ params["mu"][0]) + params["mu"][1]
    logstd = adj_hat @ (h @ params["logstd"][0]) + params["logstd"][1]
    z = mu + eps * jnp.exp(logstd)
    return jax.nn.sigmoid(z @ z.T)


def graph_model_forward_ref_mixed(params, adj_hat, x, eps):
    """Reference mirroring the kernel's precision (bf16 MXU operands, f32 acc)."""
    f32 = jnp.float32
    adj_b = adj_hat.astype(_BF16)
    h = x.astype(_BF16)
    for (w, b) in params["convs"]:
        hw = jnp.dot(h, w.astype(_BF16), preferred_element_type=f32).astype(_BF16)
        h = jnp.maximum(jnp.dot(adj_b, hw, preferred_element_type=f32) + b, 0.0)
        h = h.astype(_BF16)

    def head(w, b):
        hw = jnp.dot(h, w.astype(_BF16), preferred_element_type=f32).astype(_BF16)
        return jnp.dot(adj_b, hw, preferred_element_type=f32) + b

    mu = head(*params["mu"])
    logstd = head(*params["logstd"])
    z = (mu + eps * jnp.exp(logstd)).astype(_BF16)
    logits = jnp.dot(z, z.T, preferred_element_type=f32)
    return jax.nn.sigmoid(logits)


# ---------------------------------------------------------------------------
if __name__ == "__main__":
    N = 16                 # nodes
    NUM_FEATURES = 8
    GRAPH_LATENT_DIM = 32  # hidden_channels
    NODE_LATENT_DIM = 16   # out_channels
    NUM_LAYERS = 2

    key = jax.random.PRNGKey(0)
    k_x, k_p, k_eps = jax.random.split(key, 3)

    # Deterministic bidirectional ring graph as edge_index [2, E].
    src = jnp.arange(N, dtype=jnp.int32)
    dst = (src + 1) % N
    edge_index = jnp.concatenate(
        [jnp.stack([src, dst]), jnp.stack([dst, src])], axis=1)

    x = jax.random.normal(k_x, (N, NUM_FEATURES), jnp.float32)
    params = init_params(k_p, NUM_FEATURES, GRAPH_LATENT_DIM,
                         NODE_LATENT_DIM, NUM_LAYERS)
    eps = jax.random.normal(k_eps, (N, NODE_LATENT_DIM), jnp.float32)

    adj_hat = gcn_norm_adj(edge_index, N)

    adj_pred = graph_model_forward(params, adj_hat, x, eps)
    adj_pred = jax.block_until_ready(adj_pred)

    assert adj_pred.shape == (N, N)
    assert bool(jnp.all(jnp.isfinite(adj_pred)))

    # Tight check vs a reference that mirrors the kernel's mixed precision.
    ref_mixed = graph_model_forward_ref_mixed(params, adj_hat, x, eps)
    err_mixed = float(jnp.max(jnp.abs(adj_pred - ref_mixed)))
    assert err_mixed < 2e-3, f"mixed-precision ref mismatch: {err_mixed}"

    # Sanity check vs the pure-f32 reference (bf16 MXU operands => loose tol).
    ref_f32 = graph_model_forward_ref_f32(params, adj_hat, x, eps)
    err_f32 = float(jnp.max(jnp.abs(adj_pred - ref_f32)))
    assert err_f32 < 1e-1, f"f32 ref sanity check failed: {err_f32}"

    print("KERNEL_OK")
</pallas_src>

<mosaic_0001>
module attributes {stable_mosaic.version = 11 : i64} {
  func.func @_gcn_layer_kernel(%arg0: i32, %arg1: i32, %arg2: memref<128x128xbf16, #tpu.memory_space<vmem>>, %arg3: memref<128x128xbf16, #tpu.memory_space<vmem>>, %arg4: memref<128x128xbf16, #tpu.memory_space<vmem>>, %arg5: memref<1x128xf32, #tpu.memory_space<vmem>>, %arg6: memref<128x128xbf16, #tpu.memory_space<vmem>>, %arg7: memref<128x128xf32, #tpu.memory_space<vmem>>, %arg8: memref<128x128xbf16, #tpu.memory_space<vmem>>) attributes {dimension_semantics = [#tpu.dimension_semantics<arbitrary>, #tpu.dimension_semantics<arbitrary>], iteration_bounds = array<i64: 1, 1>, scalar_prefetch = 0 : i64, scratch_operands = 2 : i64, tpu.core_type = #tpu.core_type<tc>, window_params = [{transform_indices = @transform_0, window_bounds = array<i64: 128, 128>}, {pipeline_mode = #tpu.pipeline_mode<synchronous>, transform_indices = @transform_1, window_bounds = array<i64: 128, 128>}, {pipeline_mode = #tpu.pipeline_mode<synchronous>, transform_indices = @transform_2, window_bounds = array<i64: 128, 128>}, {pipeline_mode = #tpu.pipeline_mode<synchronous>, transform_indices = @transform_3, window_bounds = array<i64: 1, 128>}, {transform_indices = @transform_4, window_bounds = array<i64: 128, 128>}]} {
    %c128_i32 = arith.constant 128 : i32
    %0 = arith.muli %arg1, %c128_i32 : i32
    %1 = tpu.assume_multiple %0, 128 : i32
    %c0_i32 = arith.constant 0 : i32
    %2 = arith.cmpi eq, %arg0, %c0_i32 : i32
    %3 = arith.extui %2 : i1 to i32
    %c0_i32_0 = arith.constant 0 : i32
    %4 = arith.cmpi ne, %3, %c0_i32_0 : i32
    scf.if %4 {
      %18 = arith.index_cast %1 : i32 to index
      %c0_11 = arith.constant 0 : index
      %19 = vector.load %arg3[%18, %c0_11] : memref<128x128xbf16, #tpu.memory_space<vmem>>, vector<128x128xbf16>
      %c0_12 = arith.constant 0 : index
      %c0_13 = arith.constant 0 : index
      %20 = vector.load %arg4[%c0_12, %c0_13] : memref<128x128xbf16, #tpu.memory_space<vmem>>, vector<128x128xbf16>
      %cst_14 = arith.constant dense<0.000000e+00> : vector<128x128xf32>
      %21 = tpu.matmul %19, %20, %cst_14 {dimension_numbers = #tpu.dot_dimension_numbers<[1], [0], [0], [1], [0, 0, 1, 1], [], []>} : vector<128x128xbf16>, vector<128x128xbf16>, vector<128x128xf32> -> vector<128x128xf32>
      %22 = arith.truncf %21 : vector<128x128xf32> to vector<128x128xbf16>
      %23 = arith.index_cast %1 : i32 to index
      %c0_15 = arith.constant 0 : index
      %24 = vector.load %arg8[%23, %c0_15] : memref<128x128xbf16, #tpu.memory_space<vmem>>, vector<128x128xbf16>
      tpu.vector_store %arg8[%23, %c0_15], %22 {strides = array<i32>} : memref<128x128xbf16, #tpu.memory_space<vmem>>, vector<128x128xbf16>,
    } else {
    }
    %c0_i32_1 = arith.constant 0 : i32
    %5 = arith.cmpi eq, %arg1, %c0_i32_1 : i32
    %6 = arith.extui %5 : i1 to i32
    %c0_i32_2 = arith.constant 0 : i32
    %7 = arith.cmpi ne, %6, %c0_i32_2 : i32
    scf.if %7 {
      %cst_11 = arith.constant 0.000000e+00 : f32
      %18 = vector.broadcast %cst_11 : f32 to vector<128x128xf32>
      %c0_12 = arith.constant 0 : index
      %c0_13 = arith.constant 0 : index
      %19 = vector.load %arg7[%c0_12, %c0_13] : memref<128x128xf32, #tpu.memory_space<vmem>>, vector<128x128xf32>
      tpu.vector_store %arg7[%c0_12, %c0_13], %18 {strides = array<i32>} : memref<128x128xf32, #tpu.memory_space<vmem>>, vector<128x128xf32>,
    } else {
    }
    %c0 = arith.constant 0 : index
    %c0_3 = arith.constant 0 : index
    %8 = vector.load %arg7[%c0, %c0_3] : memref<128x128xf32, #tpu.memory_space<vmem>>, vector<128x128xf32>
    %c0_4 = arith.constant 0 : index
    %c0_5 = arith.constant 0 : index
    %9 = vector.load %arg2[%c0_4, %c0_5] : memref<128x128xbf16, #tpu.memory_space<vmem>>, vector<128x128xbf16>
    %10 = arith.index_cast %1 : i32 to index
    %c0_6 = arith.constant 0 : index
    %11 = vector.load %arg8[%10, %c0_6] : memref<128x128xbf16, #tpu.memory_space<vmem>>, vector<128x128xbf16>
    %cst = arith.constant dense<0.000000e+00> : vector<128x128xf32>
    %12 = tpu.matmul %9, %11, %cst {dimension_numbers = #tpu.dot_dimension_numbers<[1], [0], [0], [1], [0, 0, 1, 1], [], []>} : vector<128x128xbf16>, vector<128x128xbf16>, vector<128x128xf32> -> vector<128x128xf32>
    %13 = arith.addf %8, %12 : vector<128x128xf32>
    %c0_7 = arith.constant 0 : index
    %c0_8 = arith.constant 0 : index
    %14 = vector.load %arg7[%c0_7, %c0_8] : memref<128x128xf32, #tpu.memory_space<vmem>>, vector<128x128xf32>
    tpu.vector_store %arg7[%c0_7, %c0_8], %13 {strides = array<i32>} : memref<128x128xf32, #tpu.memory_space<vmem>>, vector<128x128xf32>,
    %c0_i32_9 = arith.constant 0 : i32
    %15 = arith.cmpi eq, %arg1, %c0_i32_9 : i32
    %16 = arith.extui %15 : i1 to i32
    %c0_i32_10 = arith.constant 0 : i32
    %17 = arith.cmpi ne, %16, %c0_i32_10 : i32
    scf.if %17 {
      %c0_11 = arith.constant 0 : index
      %c0_12 = arith.constant 0 : index
      %18 = vector.load %arg7[%c0_11, %c0_12] : memref<128x128xf32, #tpu.memory_space<vmem>>, vector<128x128xf32>
      %c0_13 = arith.constant 0 : index
      %c0_14 = arith.constant 0 : index
      %19 = vector.load %arg5[%c0_13, %c0_14] : memref<1x128xf32, #tpu.memory_space<vmem>>, vector<1x128xf32>
      %20 = vector.broadcast %19 : vector<1x128xf32> to vector<128x128xf32>
      %21 = arith.addf %18, %20 : vector<128x128xf32>
      %cst_15 = arith.constant 0.000000e+00 : f32
      %22 = vector.broadcast %cst_15 : f32 to vector<128x128xf32>
      %23 = arith.maximumf %21, %22 : vector<128x128xf32>
      %24 = arith.truncf %23 : vector<128x128xf32> to vector<128x128xbf16>
      %c0_16 = arith.constant 0 : index
      %c0_17 = arith.constant 0 : index
      %25 = vector.load %arg6[%c0_16, %c0_17] : memref<128x128xbf16, #tpu.memory_space<vmem>>, vector<128x128xbf16>
      tpu.vector_store %arg6[%c0_16, %c0_17], %24 {strides = array<i32>} : memref<128x128xbf16, #tpu.memory_space<vmem>>, vector<128x128xbf16>,
    } else {
    }
    return
  }
  func.func @transform_0(%arg0: i32, %arg1: i32) -> (i32, i32) {
    %c0_i32 = arith.constant 0 : i32
    return %arg0, %arg1 : i32, i32
  }
  func.func @transform_1(%arg0: i32, %arg1: i32) -> (i32, i32) {
    %c0_i32 = arith.constant 0 : i32
    %c0_i32_0 = arith.constant 0 : i32
    %c0_i32_1 = arith.constant 0 : i32
    return %c0_i32, %c0_i32_0 : i32, i32
  }
  func.func @transform_2(%arg0: i32, %arg1: i32) -> (i32, i32) {
    %c0_i32 = arith.constant 0 : i32
    %c0_i32_0 = arith.constant 0 : i32
    %c0_i32_1 = arith.constant 0 : i32
    return %c0_i32, %c0_i32_0 : i32, i32
  }
  func.func @transform_3(%arg0: i32, %arg1: i32) -> (i32, i32) {
    %c0_i32 = arith.constant 0 : i32
    %c0_i32_0 = arith.constant 0 : i32
    %c0_i32_1 = arith.constant 0 : i32
    return %c0_i32, %c0_i32_0 : i32, i32
  }
  func.func @transform_4(%arg0: i32, %arg1: i32) -> (i32, i32) {
    %c0_i32 = arith.constant 0 : i32
    %c0_i32_0 = arith.constant 0 : i32
    return %arg0, %c0_i32 : i32, i32
  }
}

module attributes {stable_mosaic.version = 11 : i64} {
  func.func @_gcn_layer_kernel(%arg0: i32, %arg1: i32, %arg2: memref<128x128xbf16, #tpu.memory_space<vmem>>, %arg3: memref<128x128xbf16, #tpu.memory_space<vmem>>, %arg4: memref<128x128xbf16, #tpu.memory_space<vmem>>, %arg5: memref<1x128xf32, #tpu.memory_space<vmem>>, %arg6: memref<128x128xbf16, #tpu.memory_space<vmem>>, %arg7: memref<128x128xf32, #tpu.memory_space<vmem>>, %arg8: memref<128x128xbf16, #tpu.memory_space<vmem>>) attributes {dimension_semantics = [#tpu.dimension_semantics<arbitrary>, #tpu.dimension_semantics<arbitrary>], iteration_bounds = array<i64: 1, 1>, scalar_prefetch = 0 : i64, scratch_operands = 2 : i64, tpu.core_type = #tpu.core_type<tc>, window_params = [{transform_indices = @transform_0, window_bounds = array<i64: 128, 128>}, {pipeline_mode = #tpu.pipeline_mode<synchronous>, transform_indices = @transform_1, window_bounds = array<i64: 128, 128>}, {pipeline_mode = #tpu.pipeline_mode<synchronous>, transform_indices = @transform_2, window_bounds = array<i64: 128, 128>}, {pipeline_mode = #tpu.pipeline_mode<synchronous>, transform_indices = @transform_3, window_bounds = array<i64: 1, 128>}, {transform_indices = @transform_4, window_bounds = array<i64: 128, 128>}]} {
    %c128_i32 = arith.constant 128 : i32
    %0 = arith.muli %arg1, %c128_i32 : i32
    %1 = tpu.assume_multiple %0, 128 : i32
    %c0_i32 = arith.constant 0 : i32
    %2 = arith.cmpi eq, %arg0, %c0_i32 : i32
    %3 = arith.extui %2 : i1 to i32
    %c0_i32_0 = arith.constant 0 : i32
    %4 = arith.cmpi ne, %3, %c0_i32_0 : i32
    scf.if %4 {
      %18 = arith.index_cast %1 : i32 to index
      %c0_11 = arith.constant 0 : index
      %19 = vector.load %arg3[%18, %c0_11] : memref<128x128xbf16, #tpu.memory_space<vmem>>, vector<128x128xbf16>
      %c0_12 = arith.constant 0 : index
      %c0_13 = arith.constant 0 : index
      %20 = vector.load %arg4[%c0_12, %c0_13] : memref<128x128xbf16, #tpu.memory_space<vmem>>, vector<128x128xbf16>
      %cst_14 = arith.constant dense<0.000000e+00> : vector<128x128xf32>
      %21 = tpu.matmul %19, %20, %cst_14 {dimension_numbers = #tpu.dot_dimension_numbers<[1], [0], [0], [1], [0, 0, 1, 1], [], []>} : vector<128x128xbf16>, vector<128x128xbf16>, vector<128x128xf32> -> vector<128x128xf32>
      %22 = arith.truncf %21 : vector<128x128xf32> to vector<128x128xbf16>
      %23 = arith.index_cast %1 : i32 to index
      %c0_15 = arith.constant 0 : index
      %24 = vector.load %arg8[%23, %c0_15] : memref<128x128xbf16, #tpu.memory_space<vmem>>, vector<128x128xbf16>
      tpu.vector_store %arg8[%23, %c0_15], %22 {strides = array<i32>} : memref<128x128xbf16, #tpu.memory_space<vmem>>, vector<128x128xbf16>,
    } else {
    }
    %c0_i32_1 = arith.constant 0 : i32
    %5 = arith.cmpi eq, %arg1, %c0_i32_1 : i32
    %6 = arith.extui %5 : i1 to i32
    %c0_i32_2 = arith.constant 0 : i32
    %7 = arith.cmpi ne, %6, %c0_i32_2 : i32
    scf.if %7 {
      %cst_11 = arith.constant 0.000000e+00 : f32
      %18 = vector.broadcast %cst_11 : f32 to vector<128x128xf32>
      %c0_12 = arith.constant 0 : index
      %c0_13 = arith.constant 0 : index
      %19 = vector.load %arg7[%c0_12, %c0_13] : memref<128x128xf32, #tpu.memory_space<vmem>>, vector<128x128xf32>
      tpu.vector_store %arg7[%c0_12, %c0_13], %18 {strides = array<i32>} : memref<128x128xf32, #tpu.memory_space<vmem>>, vector<128x128xf32>,
    } else {
    }
    %c0 = arith.constant 0 : index
    %c0_3 = arith.constant 0 : index
    %8 = vector.load %arg7[%c0, %c0_3] : memref<128x128xf32, #tpu.memory_space<vmem>>, vector<128x128xf32>
    %c0_4 = arith.constant 0 : index
    %c0_5 = arith.constant 0 : index
    %9 = vector.load %arg2[%c0_4, %c0_5] : memref<128x128xbf16, #tpu.memory_space<vmem>>, vector<128x128xbf16>
    %10 = arith.index_cast %1 : i32 to index
    %c0_6 = arith.constant 0 : index
    %11 = vector.load %arg8[%10, %c0_6] : memref<128x128xbf16, #tpu.memory_space<vmem>>, vector<128x128xbf16>
    %cst = arith.constant dense<0.000000e+00> : vector<128x128xf32>
    %12 = tpu.matmul %9, %11, %cst {dimension_numbers = #tpu.dot_dimension_numbers<[1], [0], [0], [1], [0, 0, 1, 1], [], []>} : vector<128x128xbf16>, vector<128x128xbf16>, vector<128x128xf32> -> vector<128x128xf32>
    %13 = arith.addf %8, %12 : vector<128x128xf32>
    %c0_7 = arith.constant 0 : index
    %c0_8 = arith.constant 0 : index
    %14 = vector.load %arg7[%c0_7, %c0_8] : memref<128x128xf32, #tpu.memory_space<vmem>>, vector<128x128xf32>
    tpu.vector_store %arg7[%c0_7, %c0_8], %13 {strides = array<i32>} : memref<128x128xf32, #tpu.memory_space<vmem>>, vector<128x128xf32>,
    %c0_i32_9 = arith.constant 0 : i32
    %15 = arith.cmpi eq, %arg1, %c0_i32_9 : i32
    %16 = arith.extui %15 : i1 to i32
    %c0_i32_10 = arith.constant 0 : i32
    %17 = arith.cmpi ne, %16, %c0_i32_10 : i32
    scf.if %17 {
      %c0_11 = arith.constant 0 : index
      %c0_12 = arith.constant 0 : index
      %18 = vector.load %arg7[%c0_11, %c0_12] : memref<128x128xf32, #tpu.memory_space<vmem>>, vector<128x128xf32>
      %c0_13 = arith.constant 0 : index
      %c0_14 = arith.constant 0 : index
      %19 = vector.load %arg5[%c0_13, %c0_14] : memref<1x128xf32, #tpu.memory_space<vmem>>, vector<1x128xf32>
      %20 = vector.broadcast %19 : vector<1x128xf32> to vector<128x128xf32>
      %21 = arith.addf %18, %20 : vector<128x128xf32>
      %cst_15 = arith.constant 0.000000e+00 : f32
      %22 = vector.broadcast %cst_15 : f32 to vector<128x128xf32>
      %23 = arith.maximumf %21, %22 : vector<128x128xf32>
      %24 = arith.truncf %23 : vector<128x128xf32> to vector<128x128xbf16>
      %c0_16 = arith.constant 0 : index
      %c0_17 = arith.constant 0 : index
      %25 = vector.load %arg6[%c0_16, %c0_17] : memref<128x128xbf16, #tpu.memory_space<vmem>>, vector<128x128xbf16>
      tpu.vector_store %arg6[%c0_16, %c0_17], %24 {strides = array<i32>} : memref<128x128xbf16, #tpu.memory_space<vmem>>, vector<128x128xbf16>,
    } else {
    }
    return
  }
  func.func @transform_0(%arg0: i32, %arg1: i32) -> (i32, i32) {
    %c0_i32 = arith.constant 0 : i32
    return %arg0, %arg1 : i32, i32
  }
  func.func @transform_1(%arg0: i32, %arg1: i32) -> (i32, i32) {
    %c0_i32 = arith.constant 0 : i32
    %c0_i32_0 = arith.constant 0 : i32
    %c0_i32_1 = arith.constant 0 : i32
    return %c0_i32, %c0_i32_0 : i32, i32
  }
  func.func @transform_2(%arg0: i32, %arg1: i32) -> (i32, i32) {
    %c0_i32 = arith.constant 0 : i32
    %c0_i32_0 = arith.constant 0 : i32
    %c0_i32_1 = arith.constant 0 : i32
    return %c0_i32, %c0_i32_0 : i32, i32
  }
  func.func @transform_3(%arg0: i32, %arg1: i32) -> (i32, i32) {
    %c0_i32 = arith.constant 0 : i32
    %c0_i32_0 = arith.constant 0 : i32
    %c0_i32_1 = arith.constant 0 : i32
    return %c0_i32, %c0_i32_0 : i32, i32
  }
  func.func @transform_4(%arg0: i32, %arg1: i32) -> (i32, i32) {
    %c0_i32 = arith.constant 0 : i32
    %c0_i32_0 = arith.constant 0 : i32
    return %arg0, %c0_i32 : i32, i32
  }
}

</mosaic_0001>

<bundles_post_ra>
// kernel: tpu_custom_call.1
= control target key start
LH: loop header
LB: loop body
LE: loop exit
PB: predicated region body
PF: predicated region fallthrough
CT: control target
= control target key end

     0   :  { %9 = vsyncpa [#allocation5], 0  ;;  %s1304_s0 = inlined_call_operand.hbm [shape: bf16[128,128], index: 0, kind: input, shape index: {}]   ;;  %s1305_s1 = inlined_call_operand.hbm [shape: bf16[128,128], index: 1, kind: input, shape index: {}]   ;;  %s1306_s2 = inlined_call_operand.hbm [shape: bf16[128,128], index: 2, kind: input, shape index: {}]   ;;  %s1307_s3 = inlined_call_operand.vmem [shape: f32[1,128], index: 3, kind: input, shape index: {}]   ;;  %s1308_s4 = inlined_call_operand.hbm [shape: bf16[128,128], index: 4, kind: output, shape index: {}]  }
   0x1   :  { %10 = vsyncpa [#allocation8], 0 }
   0x2   :  { %11 = vsyncpa [#allocation6], 0  ;;  %s1246_s15 = smov [#allocation7]   ;;  %s1247_s17 = smov [#allocation4]  }
   0x3   :  { %s29_s16 = sshll.u32 %s1246_s15, 4  ;;  %s17_s18 = sshll.u32 %s1247_s17, 4  ;;  %s30_s16 = int_to_ptr.vmem [resolvable:$true] %s29_s16  ;;  %s18_s18 = int_to_ptr.vmem [resolvable:$true] %s17_s18 }
   0x4   :  { %s1168_s19 = scalar_lea.vmem %s30_s16, 1024  ;;  %p1173_p1 = scmp.lt.s32.totalorder %s30_s16, %s30_s16 }
   0x5   :  { %p1169_p0 = scmp.ne.s32.totalorder %s30_s16, %s1168_s19  ;;  %p1174_p2 = scmp.lt.s32.totalorder %s1168_s19, %s1168_s19 }
   0x7   :  { %p1175_p3 = por %p1174_p2, %p1173_p1 }
   0x9   :  { %p1176_p4 = pnand %p1175_p3, %p1169_p0 }
   0xb   :  { %1179 = shalt.err (!%p1176_p4)
}
   0xc   :  { %s1248_s20 = smov 64   ;;  %s1249_s21 = smov 4  }
   0xd   :  { %35 = dma.hbm_to_vmem [thread:$0]  %s1305_s1, 1024, %s30_s16, [#allocation8], %s1248_s20, %s1248_s20, %s1249_s21  }
   0xe   :  { %s1188_s24 = scalar_lea.vmem %s18_s18, 1024  ;;  %p1193_p6 = scmp.lt.s32.totalorder %s18_s18, %s18_s18 }
   0xf   :  { %p1189_p5 = scmp.ne.s32.totalorder %s18_s18, %s1188_s24  ;;  %p1194_p7 = scmp.lt.s32.totalorder %s1188_s24, %s1188_s24 }
  0x11   :  { %p1195_p8 = por %p1194_p7, %p1193_p6 }
  0x13   :  { %p1196_p9 = pnand %p1195_p8, %p1189_p5 }
  0x15   :  { %1199 = shalt.err (!%p1196_p9)
}
  0x16   :  { %23 = dma.hbm_to_vmem [thread:$0]  %s1304_s0, 1024, %s18_s18, [#allocation5], %s1248_s20, %s1248_s20, %s1249_s21  }
  0x17   :  { %s1250_s27 = smov [#allocation9]  }
  0x18   :  { %s41_s28 = sshll.u32 %s1250_s27, 4  ;;  %s42_s28 = int_to_ptr.vmem [resolvable:$true] %s41_s28 }
  0x19   :  { %s1208_s29 = scalar_lea.vmem %s42_s28, 1024  ;;  %p1213_p11 = scmp.lt.s32.totalorder %s42_s28, %s42_s28 }
  0x1a   :  { %p1209_p10 = scmp.ne.s32.totalorder %s42_s28, %s1208_s29  ;;  %p1214_p12 = scmp.lt.s32.totalorder %s1208_s29, %s1208_s29 }
  0x1c   :  { %p1215_p13 = por %p1214_p12, %p1213_p11 }
  0x1e   :  { %p1216_p0 = pnand %p1215_p13, %p1209_p10 }
  0x20   :  { %1219 = shalt.err (!%p1216_p0)
}
  0x21   :  { %47 = dma.hbm_to_vmem [thread:$0]  %s1306_s2, 1024, %s42_s28, [#allocation8], %s1248_s20, %s1248_s20, %s1249_s21  }
  0x22   :  { %1240 = dma.done.wait [#allocation5], 1024  }
  0x23   :  { %1241 = vsyncadd [#allocation5], 4294966272 }
  0x24   :  { %1242 = dma.done.wait [#allocation8], 2048  }
  0x25   :  { %1243 = vsyncadd [#allocation8], 4294965248  ;;  %v1128_v0 = vld [vmem:[#allocation9 + $0x38] sm:$0xff]   ;;  %v1129_v1 = vld [vmem:[#allocation9 + $0x30] sm:$0xff]  }
  0x26   :  { %1058 = vmatprep.subr.bf16.mxu0 %v1128_v0  ;;  %v1130_v2 = vld [vmem:[#allocation9 + $0x28] sm:$0xff]   ;;  %v1131_v3 = vld [vmem:[#allocation9 + $0x20] sm:$0xff]   ;;  %v1132_v5 = vld [vmem:[#allocation9 + $0x18] sm:$0xff]  }
  0x27   :  { %1059 = vmatpush3.bf16.msra.mxu0 %v1128_v0  ;;  %v1136_v4 = vld [vmem:[#allocation7] sm:$0xff]   ;;  %v1133_v6 = vld [vmem:[#allocation9 + $0x10] sm:$0xff]   ;;  %v1134_v7 = vld [vmem:[#allocation9 + $0x8] sm:$0xff]  }
  0x28   :  { %1060 = vmatprep.subr.bf16.mxu0 %v1129_v1  ;;  %1074 = vmatprep.mubr.bf16.mxu0 %v1136_v4  ;;  %v1135_v8 = vld [vmem:[#allocation9] sm:$0xff]   ;;  %v1137_v9 = vld [vmem:[#allocation7 + $0x8] sm:$0xff]   ;;  %v1138_v10 = vld [vmem:[#allocation7 + $0x10] sm:$0xff]  }
  0x29   :  { %v1139_v11 = vld [vmem:[#allocation7 + $0x18] sm:$0xff]   ;;  %v1140_v12 = vld [vmem:[#allocation7 + $0x20] sm:$0xff]   ;;  %v1141_v13 = vld [vmem:[#allocation7 + $0x28] sm:$0xff]  }
  0x2a   :  { %v1142_v14 = vld [vmem:[#allocation7 + $0x30] sm:$0xff]   ;;  %v1143_v15 = vld [vmem:[#allocation7 + $0x38] sm:$0xff]   ;;  %v1152_v16 = vld [vmem:[#allocation4] sm:$0xff]  }
  0x2b   :  { %1061 = vmatpush3.bf16.msra.mxu0 %v1129_v1  ;;  %1106 = vmatprep.mubr.bf16.mxu1 %v1152_v16  ;;  %v1153_v49 = vld [vmem:[#allocation4 + $0x8] sm:$0xff]   ;;  %v1154_v50 = vld [vmem:[#allocation4 + $0x10] sm:$0xff]   ;;  %v1155_v51 = vld [vmem:[#allocation4 + $0x18] sm:$0xff]  }
  0x2c   :  { %1062 = vmatprep.subr.bf16.mxu0 %v1130_v2  ;;  %v1156_v52 = vld [vmem:[#allocation4 + $0x20] sm:$0xff]   ;;  %v1157_v53 = vld [vmem:[#allocation4 + $0x28] sm:$0xff]   ;;  %v1158_v54 = vld [vmem:[#allocation4 + $0x30] sm:$0xff]  }
  0x2d   :  { %v1159_v55 = vld [vmem:[#allocation4 + $0x38] sm:$0xff]   ;;  %v883_v57 = vld [vmem:[%s1307_s3] ss:$0 sm:$0xff]  ;;  %s1251_s3 = smov [#allocation10]  }
  0x2e   :  { %s816_s5 = sshll.u32 %s1251_s3, 4  ;;  %s817_s5 = int_to_ptr.vmem [resolvable:$true] %s816_s5 }
  0x2f   :  { %1063 = vmatpush3.bf16.msra.mxu0 %v1130_v2  ;;  %s1220_s6 = scalar_lea.vmem %s817_s5, 1024  ;;  %p1225_p2 = scmp.lt.s32.totalorder %s817_s5, %s817_s5 }
  0x30   :  { %1064 = vmatprep.subr.bf16.mxu0 %v1131_v3  ;;  %p1221_p1 = scmp.ne.s32.totalorder %s817_s5, %s1220_s6  ;;  %p1226_p3 = scmp.lt.s32.totalorder %s1220_s6, %s1220_s6 }
  0x32   :  { %p1227_p4 = por %p1226_p3, %p1225_p2 }
  0x33   :  { %1065 = vmatpush3.bf16.msra.mxu0 %v1131_v3 }
  0x34   :  { %1066 = vmatprep.subr.bf16.mxu0 %v1132_v5  ;;  %p1228_p5 = pnand %p1227_p4, %p1221_p1 }
  0x37   :  { %1067 = vmatpush3.bf16.msra.mxu0 %v1132_v5 }
  0x38   :  { %1068 = vmatprep.subr.bf16.mxu0 %v1133_v6 }
  0x3b   :  { %1069 = vmatpush3.bf16.msra.mxu0 %v1133_v6 }
  0x3c   :  { %1070 = vmatprep.subr.bf16.mxu0 %v1134_v7 }
  0x3f   :  { %1071 = vmatpush3.bf16.msra.mxu0 %v1134_v7 }
  0x40   :  { %1072 = vmatprep.subr.bf16.mxu0 %v1135_v8 }
  0x43   :  { %1073 = vmatpush3.bf16.msra.mxu0 %v1135_v8 }
  0x46   :  { %1075 = vmatmul.mubr.bf16.vlgmr.msra.gmra.mxu0 %v1137_v9 }
  0x47   :  { %1078 = vmatprep.mubr.bf16.mxu0 %v1138_v10 }
  0x4e   :  { %1079 = vmatmul.mubr.bf16.gmra.mxu0 %v1139_v11 }
  0x4f   :  { %1082 = vmatprep.mubr.bf16.mxu0 %v1140_v12 }
  0x56   :  { %1083 = vmatmul.mubr.bf16.gmra.mxu0 %v1141_v13 }
  0x57   :  { %1086 = vmatprep.mubr.bf16.mxu0 %v1142_v14 }
  0x5e   :  { %1087 = vmatmul.mubr.bf16.gmra.mxu0 %v1143_v15 }
 0x106   :  { %v1076_v17 = vpop.f32.mrf.mxu0 }
 0x108   :  { %v231_v18 = vpop.f32.mrf.mxu0 }
 0x10a   :  { %v1077_v19 = vpop.f32.mrf.mxu0 }
 0x10b   :  { %v940_v20 = vpack.c.bf16 %v1077_v19, %v1076_v17 }
 0x10c   :  { %v234_v21 = vpop.f32.mrf.mxu0 }
 0x10d   :  { %1012 = vst [vmem:[#allocation3 + $0x8] sm:$0xff] %v940_v20   ;;  %v935_v22 = vpack.c.bf16 %v234_v21, %v231_v18 }
 0x10e   :  { %v1080_v23 = vpop.f32.mrf.mxu0 }
 0x10f   :  { %936 = vst [vmem:[#allocation3] sm:$0xff] %v935_v22  }
 0x110   :  { %v247_v24 = vpop.f32.mrf.mxu0 }
 0x112   :  { %v1081_v25 = vpop.f32.mrf.mxu0 }
 0x113   :  { %v950_v26 = vpack.c.bf16 %v1081_v25, %v1080_v23 }
 0x114   :  { %v250_v27 = vpop.f32.mrf.mxu0  ;;  %v1150_v47 = vld [vmem:[#allocation3 + $0x8] sm:$0xff]  }
 0x115   :  { %1014 = vst [vmem:[#allocation3 + $0x18] sm:$0xff] %v950_v26   ;;  %v945_v28 = vpack.c.bf16 %v250_v27, %v247_v24 }
 0x116   :  { %v1084_v29 = vpop.f32.mrf.mxu0  ;;  %v1151_v48 = vld [vmem:[#allocation3] sm:$0xff]  }
 0x117   :  { %1013 = vst [vmem:[#allocation3 + $0x10] sm:$0xff] %v945_v28  }
 0x118   :  { %v263_v30 = vpop.f32.mrf.mxu0 }
 0x11a   :  { %v1085_v31 = vpop.f32.mrf.mxu0 }
 0x11b   :  { %v960_v32 = vpack.c.bf16 %v1085_v31, %v1084_v29 }
 0x11c   :  { %v266_v33 = vpop.f32.mrf.mxu0  ;;  %v1148_v45 = vld [vmem:[#allocation3 + $0x18] sm:$0xff]  }
 0x11d   :  { %1016 = vst [vmem:[#allocation3 + $0x28] sm:$0xff] %v960_v32   ;;  %v955_v34 = vpack.c.bf16 %v266_v33, %v263_v30 }
 0x11e   :  { %v1088_v35 = vpop.f32.mrf.mxu0  ;;  %v1149_v46 = vld [vmem:[#allocation3 + $0x10] sm:$0xff]  }
 0x11f   :  { %1015 = vst [vmem:[#allocation3 + $0x20] sm:$0xff] %v955_v34  }
 0x120   :  { %v279_v36 = vpop.f32.mrf.mxu0 }
 0x122   :  { %v1089_v37 = vpop.f32.mrf.mxu0 }
 0x123   :  { %v970_v38 = vpack.c.bf16 %v1089_v37, %v1088_v35 }
 0x124   :  { %v282_v39 = vpop.f32.mrf.mxu0  ;;  %v1146_v43 = vld [vmem:[#allocation3 + $0x28] sm:$0xff]  }
 0x125   :  { %1018 = vst [vmem:[#allocation3 + $0x38] sm:$0xff] %v970_v38   ;;  %v965_v40 = vpack.c.bf16 %v282_v39, %v279_v36 }
 0x126   :  { %v1147_v44 = vld [vmem:[#allocation3 + $0x20] sm:$0xff]  }
 0x127   :  { %1017 = vst [vmem:[#allocation3 + $0x30] sm:$0xff] %v965_v40  }
 0x12c   :  { %v1144_v41 = vld [vmem:[#allocation3 + $0x38] sm:$0xff]  }
 0x12d   :  { %1090 = vmatprep.subr.bf16.mxu1 %v1144_v41 }
 0x12e   :  { %v1145_v42 = vld [vmem:[#allocation3 + $0x30] sm:$0xff]   ;;  %1091 = vmatpush3.bf16.msra.mxu1 %v1144_v41 }
 0x12f   :  { %1092 = vmatprep.subr.bf16.mxu1 %v1145_v42 }
 0x132   :  { %1093 = vmatpush3.bf16.msra.mxu1 %v1145_v42 }
 0x133   :  { %1094 = vmatprep.subr.bf16.mxu1 %v1146_v43 }
 0x136   :  { %1095 = vmatpush3.bf16.msra.mxu1 %v1146_v43 }
 0x137   :  { %1096 = vmatprep.subr.bf16.mxu1 %v1147_v44 }
 0x13a   :  { %1097 = vmatpush3.bf16.msra.mxu1 %v1147_v44 }
 0x13b   :  { %1098 = vmatprep.subr.bf16.mxu1 %v1148_v45 }
 0x13e   :  { %1099 = vmatpush3.bf16.msra.mxu1 %v1148_v45 }
 0x13f   :  { %1100 = vmatprep.subr.bf16.mxu1 %v1149_v46 }
 0x142   :  { %1101 = vmatpush3.bf16.msra.mxu1 %v1149_v46 }
 0x143   :  { %1102 = vmatprep.subr.bf16.mxu1 %v1150_v47 }
 0x146   :  { %1103 = vmatpush3.bf16.msra.mxu1 %v1150_v47 }
 0x147   :  { %1104 = vmatprep.subr.bf16.mxu1 %v1151_v48 }
 0x14a   :  { %1105 = vmatpush3.bf16.msra.mxu1 %v1151_v48 }
 0x14d   :  { %1107 = vmatmul.mubr.bf16.vlgmr.msra.gmra.mxu1 %v1153_v49 }
 0x14e   :  { %1110 = vmatprep.mubr.bf16.mxu1 %v1154_v50 }
 0x155   :  { %1111 = vmatmul.mubr.bf16.gmra.mxu1 %v1155_v51 }
 0x156   :  { %1114 = vmatprep.mubr.bf16.mxu1 %v1156_v52 }
 0x15d   :  { %1115 = vmatmul.mubr.bf16.gmra.mxu1 %v1157_v53 }
 0x15e   :  { %1118 = vmatprep.mubr.bf16.mxu1 %v1158_v54 }
 0x165   :  { %1119 = vmatmul.mubr.bf16.gmra.mxu1 %v1159_v55 }
 0x20d   :  { %v1108_v56 = vpop.f32.mrf.mxu1 }
 0x20e   :  { %v701_v59 = vadd.f32 %v1108_v56, %v883_v57 }
 0x20f   :  { %v578_v58 = vpop.f32.mrf.mxu1 }
 0x210   :  { %v699_v61 = vadd.f32 %v883_v57, %v578_v58  ;;  %v717_v0 = vmax.f32 %v701_v59, 0.0 }
 0x211   :  { %v1109_v60 = vpop.f32.mrf.mxu1 }
 0x212   :  { %v702_v62 = vadd.f32 %v1109_v60, %v883_v57  ;;  %v715_v4 = vmax.f32 %v699_v61, 0.0 }
 0x213   :  { %v581_v63 = vpop.f32.mrf.mxu1 }
 0x214   :  { %v718_v1 = vmax.f32 %v702_v62, 0.0  ;;  %v700_v2 = vadd.f32 %v883_v57, %v581_v63 }
 0x215   :  { %v1112_v3 = vpop.f32.mrf.mxu1 }
 0x216   :  { %v980_v5 = vpack.c.bf16 %v718_v1, %v717_v0  ;;  %v716_v6 = vmax.f32 %v700_v2, 0.0  ;;  %v705_v9 = vadd.f32 %v1112_v3, %v883_v57 }
 0x217   :  { %v594_v7 = vpop.f32.mrf.mxu1 }
 0x218   :  { %1019 = vst [vmem:[#allocation10 + $0x8] sm:$0xff] %v980_v5   ;;  %v975_v8 = vpack.c.bf16 %v716_v6, %v715_v4  ;;  %v703_v11 = vadd.f32 %v883_v57, %v594_v7  ;;  %v721_v14 = vmax.f32 %v705_v9, 0.0 }
 0x219   :  { %v1113_v10 = vpop.f32.mrf.mxu1 }
 0x21a   :  { %976 = vst [vmem:[#allocation10] sm:$0xff] %v975_v8   ;;  %v706_v12 = vadd.f32 %v1113_v10, %v883_v57  ;;  %v719_v18 = vmax.f32 %v703_v11, 0.0 }
 0x21b   :  { %v597_v13 = vpop.f32.mrf.mxu1 }
 0x21c   :  { %v722_v15 = vmax.f32 %v706_v12, 0.0  ;;  %v704_v16 = vadd.f32 %v883_v57, %v597_v13 }
 0x21d   :  { %v1116_v17 = vpop.f32.mrf.mxu1 }
 0x21e   :  { %v990_v19 = vpack.c.bf16 %v722_v15, %v721_v14  ;;  %v720_v20 = vmax.f32 %v704_v16, 0.0  ;;  %v709_v23 = vadd.f32 %v1116_v17, %v883_v57 }
 0x21f   :  { %v610_v21 = vpop.f32.mrf.mxu1 }
 0x220   :  { %1021 = vst [vmem:[#allocation10 + $0x18] sm:$0xff] %v990_v19   ;;  %v985_v22 = vpack.c.bf16 %v720_v20, %v719_v18  ;;  %v707_v25 = vadd.f32 %v883_v57, %v610_v21  ;;  %v725_v28 = vmax.f32 %v709_v23, 0.0 }
 0x221   :  { %v1117_v24 = vpop.f32.mrf.mxu1 }
 0x222   :  { %1020 = vst [vmem:[#allocation10 + $0x10] sm:$0xff] %v985_v22   ;;  %v710_v26 = vadd.f32 %v1117_v24, %v883_v57  ;;  %v723_v32 = vmax.f32 %v707_v25, 0.0 }
 0x223   :  { %v613_v27 = vpop.f32.mrf.mxu1 }
 0x224   :  { %v726_v29 = vmax.f32 %v710_v26, 0.0  ;;  %v708_v30 = vadd.f32 %v883_v57, %v613_v27 }
 0x225   :  { %v1120_v31 = vpop.f32.mrf.mxu1 }
 0x226   :  { %v1000_v33 = vpack.c.bf16 %v726_v29, %v725_v28  ;;  %v724_v34 = vmax.f32 %v708_v30, 0.0  ;;  %v713_v37 = vadd.f32 %v1120_v31, %v883_v57 }
 0x227   :  { %v626_v35 = vpop.f32.mrf.mxu1 }
 0x228   :  { %1023 = vst [vmem:[#allocation10 + $0x28] sm:$0xff] %v1000_v33   ;;  %v995_v36 = vpack.c.bf16 %v724_v34, %v723_v32  ;;  %v711_v39 = vadd.f32 %v883_v57, %v626_v35  ;;  %v729_v42 = vmax.f32 %v713_v37, 0.0 }
 0x229   :  { %v1121_v38 = vpop.f32.mrf.mxu1 }
 0x22a   :  { %1022 = vst [vmem:[#allocation10 + $0x20] sm:$0xff] %v995_v36   ;;  %v714_v40 = vadd.f32 %v1121_v38, %v883_v57  ;;  %v727_v45 = vmax.f32 %v711_v39, 0.0 }
 0x22b   :  { %v629_v41 = vpop.f32.mrf.mxu1 }
 0x22c   :  { %v730_v43 = vmax.f32 %v714_v40, 0.0  ;;  %v712_v44 = vadd.f32 %v883_v57, %v629_v41 }
 0x22e   :  { %v1010_v46 = vpack.c.bf16 %v730_v43, %v729_v42  ;;  %v728_v47 = vmax.f32 %v712_v44, 0.0 }
 0x230   :  { %1025 = vst [vmem:[#allocation10 + $0x38] sm:$0xff] %v1010_v46   ;;  %v1005_v48 = vpack.c.bf16 %v728_v47, %v727_v45 }
 0x232   :  { %1024 = vst [vmem:[#allocation10 + $0x30] sm:$0xff] %v1005_v48  }
 0x233   :  { %1231 = shalt.err (!%p1228_p5)
}
 0x234   :  { %822 = dma.vmem_to_hbm [thread:$0]  %s817_s5, 1024, %s1308_s4, [#allocation6], %s1248_s20, %s1248_s20, %s1249_s21  }
 0x235   :  { %1244 = dma.done.wait [#allocation6], 1024  }
 0x236   :  { %1245 = vsyncadd [#allocation6], 4294966272 }
 0x237   :  { %826 = vsyncpa [#allocation5], 1 }
 0x238   :  { %827 = vsyncpa [#allocation8], 1 }
 0x239   :  { %828 = vsyncpa [#allocation6], 1 }

// kernel: tpu_custom_call.1
= control target key start
LH: loop header
LB: loop body
LE: loop exit
PB: predicated region body
PF: predicated region fallthrough
CT: control target
= control target key end

     0   :  { %9 = vsyncpa [#allocation5], 0  ;;  %s1304_s0 = inlined_call_operand.hbm [shape: bf16[128,128], index: 0, kind: input, shape index: {}]   ;;  %s1305_s1 = inlined_call_operand.hbm [shape: bf16[128,128], index: 1, kind: input, shape index: {}]   ;;  %s1306_s2 = inlined_call_operand.hbm [shape: bf16[128,128], index: 2, kind: input, shape index: {}]   ;;  %s1307_s3 = inlined_call_operand.vmem [shape: f32[1,128], index: 3, kind: input, shape index: {}]   ;;  %s1308_s4 = inlined_call_operand.hbm [shape: bf16[128,128], index: 4, kind: output, shape index: {}]  }
   0x1   :  { %10 = vsyncpa [#allocation8], 0 }
   0x2   :  { %11 = vsyncpa [#allocation6], 0  ;;  %s1246_s15 = smov [#allocation7]   ;;  %s1247_s17 = smov [#allocation4]  }
   0x3   :  { %s29_s16 = sshll.u32 %s1246_s15, 4  ;;  %s17_s18 = sshll.u32 %s1247_s17, 4  ;;  %s30_s16 = int_to_ptr.vmem [resolvable:$true] %s29_s16  ;;  %s18_s18 = int_to_ptr.vmem [resolvable:$true] %s17_s18 }
   0x4   :  { %s1168_s19 = scalar_lea.vmem %s30_s16, 1024  ;;  %p1173_p1 = scmp.lt.s32.totalorder %s30_s16, %s30_s16 }
   0x5   :  { %p1169_p0 = scmp.ne.s32.totalorder %s30_s16, %s1168_s19  ;;  %p1174_p2 = scmp.lt.s32.totalorder %s1168_s19, %s1168_s19 }
   0x7   :  { %p1175_p3 = por %p1174_p2, %p1173_p1 }
   0x9   :  { %p1176_p4 = pnand %p1175_p3, %p1169_p0 }
   0xb   :  { %1179 = shalt.err (!%p1176_p4)
}
   0xc   :  { %s1248_s20 = smov 64   ;;  %s1249_s21 = smov 4  }
   0xd   :  { %35 = dma.hbm_to_vmem [thread:$0]  %s1305_s1, 1024, %s30_s16, [#allocation8], %s1248_s20, %s1248_s20, %s1249_s21  }
   0xe   :  { %s1188_s24 = scalar_lea.vmem %s18_s18, 1024  ;;  %p1193_p6 = scmp.lt.s32.totalorder %s18_s18, %s18_s18 }
   0xf   :  { %p1189_p5 = scmp.ne.s32.totalorder %s18_s18, %s1188_s24  ;;  %p1194_p7 = scmp.lt.s32.totalorder %s1188_s24, %s1188_s24 }
  0x11   :  { %p1195_p8 = por %p1194_p7, %p1193_p6 }
  0x13   :  { %p1196_p9 = pnand %p1195_p8, %p1189_p5 }
  0x15   :  { %1199 = shalt.err (!%p1196_p9)
}
  0x16   :  { %23 = dma.hbm_to_vmem [thread:$0]  %s1304_s0, 1024, %s18_s18, [#allocation5], %s1248_s20, %s1248_s20, %s1249_s21  }
  0x17   :  { %s1250_s27 = smov [#allocation9]  }
  0x18   :  { %s41_s28 = sshll.u32 %s1250_s27, 4  ;;  %s42_s28 = int_to_ptr.vmem [resolvable:$true] %s41_s28 }
  0x19   :  { %s1208_s29 = scalar_lea.vmem %s42_s28, 1024  ;;  %p1213_p11 = scmp.lt.s32.totalorder %s42_s28, %s42_s28 }
  0x1a   :  { %p1209_p10 = scmp.ne.s32.totalorder %s42_s28, %s1208_s29  ;;  %p1214_p12 = scmp.lt.s32.totalorder %s1208_s29, %s1208_s29 }
  0x1c   :  { %p1215_p13 = por %p1214_p12, %p1213_p11 }
  0x1e   :  { %p1216_p0 = pnand %p1215_p13, %p1209_p10 }
  0x20   :  { %1219 = shalt.err (!%p1216_p0)
}
  0x21   :  { %47 = dma.hbm_to_vmem [thread:$0]  %s1306_s2, 1024, %s42_s28, [#allocation8], %s1248_s20, %s1248_s20, %s1249_s21  }
  0x22   :  { %1240 = dma.done.wait [#allocation5], 1024  }
  0x23   :  { %1241 = vsyncadd [#allocation5], 4294966272 }
  0x24   :  { %1242 = dma.done.wait [#allocation8], 2048  }
  0x25   :  { %1243 = vsyncadd [#allocation8], 4294965248  ;;  %v1128_v0 = vld [vmem:[#allocation9 + $0x38] sm:$0xff]   ;;  %v1129_v1 = vld [vmem:[#allocation9 + $0x30] sm:$0xff]  }
  0x26   :  { %1058 = vmatprep.subr.bf16.mxu0 %v1128_v0  ;;  %v1130_v2 = vld [vmem:[#allocation9 + $0x28] sm:$0xff]   ;;  %v1131_v3 = vld [vmem:[#allocation9 + $0x20] sm:$0xff]   ;;  %v1132_v5 = vld [vmem:[#allocation9 + $0x18] sm:$0xff]  }
  0x27   :  { %1059 = vmatpush3.bf16.msra.mxu0 %v1128_v0  ;;  %v1136_v4 = vld [vmem:[#allocation7] sm:$0xff]   ;;  %v1133_v6 = vld [vmem:[#allocation9 + $0x10] sm:$0xff]   ;;  %v1134_v7 = vld [vmem:[#allocation9 + $0x8] sm:$0xff]  }
  0x28   :  { %1060 = vmatprep.subr.bf16.mxu0 %v1129_v1  ;;  %1074 = vmatprep.mubr.bf16.mxu0 %v1136_v4  ;;  %v1135_v8 = vld [vmem:[#allocation9] sm:$0xff]   ;;  %v1137_v9 = vld [vmem:[#allocation7 + $0x8] sm:$0xff]   ;;  %v1138_v10 = vld [vmem:[#allocation7 + $0x10] sm:$0xff]  }
  0x29   :  { %v1139_v11 = vld [vmem:[#allocation7 + $0x18] sm:$0xff]   ;;  %v1140_v12 = vld [vmem:[#allocation7 + $0x20] sm:$0xff]   ;;  %v1141_v13 = vld [vmem:[#allocation7 + $0x28] sm:$0xff]  }
  0x2a   :  { %v1142_v14 = vld [vmem:[#allocation7 + $0x30] sm:$0xff]   ;;  %v1143_v15 = vld [vmem:[#allocation7 + $0x38] sm:$0xff]   ;;  %v1152_v16 = vld [vmem:[#allocation4] sm:$0xff]  }
  0x2b   :  { %1061 = vmatpush3.bf16.msra.mxu0 %v1129_v1  ;;  %1106 = vmatprep.mubr.bf16.mxu1 %v1152_v16  ;;  %v1153_v49 = vld [vmem:[#allocation4 + $0x8] sm:$0xff]   ;;  %v1154_v50 = vld [vmem:[#allocation4 + $0x10] sm:$0xff]   ;;  %v1155_v51 = vld [vmem:[#allocation4 + $0x18] sm:$0xff]  }
  0x2c   :  { %1062 = vmatprep.subr.bf16.mxu0 %v1130_v2  ;;  %v1156_v52 = vld [vmem:[#allocation4 + $0x20] sm:$0xff]   ;;  %v1157_v53 = vld [vmem:[#allocation4 + $0x28] sm:$0xff]   ;;  %v1158_v54 = vld [vmem:[#allocation4 + $0x30] sm:$0xff]  }
  0x2d   :  { %v1159_v55 = vld [vmem:[#allocation4 + $0x38] sm:$0xff]   ;;  %v883_v57 = vld [vmem:[%s1307_s3] ss:$0 sm:$0xff]  ;;  %s1251_s3 = smov [#allocation10]  }
  0x2e   :  { %s816_s5 = sshll.u32 %s1251_s3, 4  ;;  %s817_s5 = int_to_ptr.vmem [resolvable:$true] %s816_s5 }
  0x2f   :  { %1063 = vmatpush3.bf16.msra.mxu0 %v1130_v2  ;;  %s1220_s6 = scalar_lea.vmem %s817_s5, 1024  ;;  %p1225_p2 = scmp.lt.s32.totalorder %s817_s5, %s817_s5 }
  0x30   :  { %1064 = vmatprep.subr.bf16.mxu0 %v1131_v3  ;;  %p1221_p1 = scmp.ne.s32.totalorder %s817_s5, %s1220_s6  ;;  %p1226_p3 = scmp.lt.s32.totalorder %s1220_s6, %s1220_s6 }
  0x32   :  { %p1227_p4 = por %p1226_p3, %p1225_p2 }
  0x33   :  { %1065 = vmatpush3.bf16.msra.mxu0 %v1131_v3 }
  0x34   :  { %1066 = vmatprep.subr.bf16.mxu0 %v1132_v5  ;;  %p1228_p5 = pnand %p1227_p4, %p1221_p1 }
  0x37   :  { %1067 = vmatpush3.bf16.msra.mxu0 %v1132_v5 }
  0x38   :  { %1068 = vmatprep.subr.bf16.mxu0 %v1133_v6 }
  0x3b   :  { %1069 = vmatpush3.bf16.msra.mxu0 %v1133_v6 }
  0x3c   :  { %1070 = vmatprep.subr.bf16.mxu0 %v1134_v7 }
  0x3f   :  { %1071 = vmatpush3.bf16.msra.mxu0 %v1134_v7 }
  0x40   :  { %1072 = vmatprep.subr.bf16.mxu0 %v1135_v8 }
  0x43   :  { %1073 = vmatpush3.bf16.msra.mxu0 %v1135_v8 }
  0x46   :  { %1075 = vmatmul.mubr.bf16.vlgmr.msra.gmra.mxu0 %v1137_v9 }
  0x47   :  { %1078 = vmatprep.mubr.bf16.mxu0 %v1138_v10 }
  0x4e   :  { %1079 = vmatmul.mubr.bf16.gmra.mxu0 %v1139_v11 }
  0x4f   :  { %1082 = vmatprep.mubr.bf16.mxu0 %v1140_v12 }
  0x56   :  { %1083 = vmatmul.mubr.bf16.gmra.mxu0 %v1141_v13 }
  0x57   :  { %1086 = vmatprep.mubr.bf16.mxu0 %v1142_v14 }
  0x5e   :  { %1087 = vmatmul.mubr.bf16.gmra.mxu0 %v1143_v15 }
 0x106   :  { %v1076_v17 = vpop.f32.mrf.mxu0 }
 0x108   :  { %v231_v18 = vpop.f32.mrf.mxu0 }
 0x10a   :  { %v1077_v19 = vpop.f32.mrf.mxu0 }
 0x10b   :  { %v940_v20 = vpack.c.bf16 %v1077_v19, %v1076_v17 }
 0x10c   :  { %v234_v21 = vpop.f32.mrf.mxu0 }
 0x10d   :  { %1012 = vst [vmem:[#allocation3 + $0x8] sm:$0xff] %v940_v20   ;;  %v935_v22 = vpack.c.bf16 %v234_v21, %v231_v18 }
 0x10e   :  { %v1080_v23 = vpop.f32.mrf.mxu0 }
 0x10f   :  { %936 = vst [vmem:[#allocation3] sm:$0xff] %v935_v22  }
 0x110   :  { %v247_v24 = vpop.f32.mrf.mxu0 }
 0x112   :  { %v1081_v25 = vpop.f32.mrf.mxu0 }
 0x113   :  { %v950_v26 = vpack.c.bf16 %v1081_v25, %v1080_v23 }
 0x114   :  { %v250_v27 = vpop.f32.mrf.mxu0  ;;  %v1150_v47 = vld [vmem:[#allocation3 + $0x8] sm:$0xff]  }
 0x115   :  { %1014 = vst [vmem:[#allocation3 + $0x18] sm:$0xff] %v950_v26   ;;  %v945_v28 = vpack.c.bf16 %v250_v27, %v247_v24 }
 0x116   :  { %v1084_v29 = vpop.f32.mrf.mxu0  ;;  %v1151_v48 = vld [vmem:[#allocation3] sm:$0xff]  }
 0x117   :  { %1013 = vst [vmem:[#allocation3 + $0x10] sm:$0xff] %v945_v28  }
 0x118   :  { %v263_v30 = vpop.f32.mrf.mxu0 }
 0x11a   :  { %v1085_v31 = vpop.f32.mrf.mxu0 }
 0x11b   :  { %v960_v32 = vpack.c.bf16 %v1085_v31, %v1084_v29 }
 0x11c   :  { %v266_v33 = vpop.f32.mrf.mxu0  ;;  %v1148_v45 = vld [vmem:[#allocation3 + $0x18] sm:$0xff]  }
 0x11d   :  { %1016 = vst [vmem:[#allocation3 + $0x28] sm:$0xff] %v960_v32   ;;  %v955_v34 = vpack.c.bf16 %v266_v33, %v263_v30 }
 0x11e   :  { %v1088_v35 = vpop.f32.mrf.mxu0  ;;  %v1149_v46 = vld [vmem:[#allocation3 + $0x10] sm:$0xff]  }
 0x11f   :  { %1015 = vst [vmem:[#allocation3 + $0x20] sm:$0xff] %v955_v34  }
 0x120   :  { %v279_v36 = vpop.f32.mrf.mxu0 }
 0x122   :  { %v1089_v37 = vpop.f32.mrf.mxu0 }
 0x123   :  { %v970_v38 = vpack.c.bf16 %v1089_v37, %v1088_v35 }
 0x124   :  { %v282_v39 = vpop.f32.mrf.mxu0  ;;  %v1146_v43 = vld [vmem:[#allocation3 + $0x28] sm:$0xff]  }
 0x125   :  { %1018 = vst [vmem:[#allocation3 + $0x38] sm:$0xff] %v970_v38   ;;  %v965_v40 = vpack.c.bf16 %v282_v39, %v279_v36 }
 0x126   :  { %v1147_v44 = vld [vmem:[#allocation3 + $0x20] sm:$0xff]  }
 0x127   :  { %1017 = vst [vmem:[#allocation3 + $0x30] sm:$0xff] %v965_v40  }
 0x12c   :  { %v1144_v41 = vld [vmem:[#allocation3 + $0x38] sm:$0xff]  }
 0x12d   :  { %1090 = vmatprep.subr.bf16.mxu1 %v1144_v41 }
 0x12e   :  { %v1145_v42 = vld [vmem:[#allocation3 + $0x30] sm:$0xff]   ;;  %1091 = vmatpush3.bf16.msra.mxu1 %v1144_v41 }
 0x12f   :  { %1092 = vmatprep.subr.bf16.mxu1 %v1145_v42 }
 0x132   :  { %1093 = vmatpush3.bf16.msra.mxu1 %v1145_v42 }
 0x133   :  { %1094 = vmatprep.subr.bf16.mxu1 %v1146_v43 }
 0x136   :  { %1095 = vmatpush3.bf16.msra.mxu1 %v1146_v43 }
 0x137   :  { %1096 = vmatprep.subr.bf16.mxu1 %v1147_v44 }
 0x13a   :  { %1097 = vmatpush3.bf16.msra.mxu1 %v1147_v44 }
 0x13b   :  { %1098 = vmatprep.subr.bf16.mxu1 %v1148_v45 }
 0x13e   :  { %1099 = vmatpush3.bf16.msra.mxu1 %v1148_v45 }
 0x13f   :  { %1100 = vmatprep.subr.bf16.mxu1 %v1149_v46 }
 0x142   :  { %1101 = vmatpush3.bf16.msra.mxu1 %v1149_v46 }
 0x143   :  { %1102 = vmatprep.subr.bf16.mxu1 %v1150_v47 }
 0x146   :  { %1103 = vmatpush3.bf16.msra.mxu1 %v1150_v47 }
 0x147   :  { %1104 = vmatprep.subr.bf16.mxu1 %v1151_v48 }
 0x14a   :  { %1105 = vmatpush3.bf16.msra.mxu1 %v1151_v48 }
 0x14d   :  { %1107 = vmatmul.mubr.bf16.vlgmr.msra.gmra.mxu1 %v1153_v49 }
 0x14e   :  { %1110 = vmatprep.mubr.bf16.mxu1 %v1154_v50 }
 0x155   :  { %1111 = vmatmul.mubr.bf16.gmra.mxu1 %v1155_v51 }
 0x156   :  { %1114 = vmatprep.mubr.bf16.mxu1 %v1156_v52 }
 0x15d   :  { %1115 = vmatmul.mubr.bf16.gmra.mxu1 %v1157_v53 }
 0x15e   :  { %1118 = vmatprep.mubr.bf16.mxu1 %v1158_v54 }
 0x165   :  { %1119 = vmatmul.mubr.bf16.gmra.mxu1 %v1159_v55 }
 0x20d   :  { %v1108_v56 = vpop.f32.mrf.mxu1 }
 0x20e   :  { %v701_v59 = vadd.f32 %v1108_v56, %v883_v57 }
 0x20f   :  { %v578_v58 = vpop.f32.mrf.mxu1 }
 0x210   :  { %v699_v61 = vadd.f32 %v883_v57, %v578_v58  ;;  %v717_v0 = vmax.f32 %v701_v59, 0.0 }
 0x211   :  { %v1109_v60 = vpop.f32.mrf.mxu1 }
 0x212   :  { %v702_v62 = vadd.f32 %v1109_v60, %v883_v57  ;;  %v715_v4 = vmax.f32 %v699_v61, 0.0 }
 0x213   :  { %v581_v63 = vpop.f32.mrf.mxu1 }
 0x214   :  { %v718_v1 = vmax.f32 %v702_v62, 0.0  ;;  %v700_v2 = vadd.f32 %v883_v57, %v581_v63 }
 0x215   :  { %v1112_v3 = vpop.f32.mrf.mxu1 }
 0x216   :  { %v980_v5 = vpack.c.bf16 %v718_v1, %v717_v0  ;;  %v716_v6 = vmax.f32 %v700_v2, 0.0  ;;  %v705_v9 = vadd.f32 %v1112_v3, %v883_v57 }
 0x217   :  { %v594_v7 = vpop.f32.mrf.mxu1 }
 0x218   :  { %1019 = vst [vmem:[#allocation10 + $0x8] sm:$0xff] %v980_v5   ;;  %v975_v8 = vpack.c.bf16 %v716_v6, %v715_v4  ;;  %v703_v11 = vadd.f32 %v883_v57, %v594_v7  ;;  %v721_v14 = vmax.f32 %v705_v9, 0.0 }
 0x219   :  { %v1113_v10 = vpop.f32.mrf.mxu1 }
 0x21a   :  { %976 = vst [vmem:[#allocation10] sm:$0xff] %v975_v8   ;;  %v706_v12 = vadd.f32 %v1113_v10, %v883_v57  ;;  %v719_v18 = vmax.f32 %v703_v11, 0.0 }
 0x21b   :  { %v597_v13 = vpop.f32.mrf.mxu1 }
 0x21c   :  { %v722_v15 = vmax.f32 %v706_v12, 0.0  ;;  %v704_v16 = vadd.f32 %v883_v57, %v597_v13 }
 0x21d   :  { %v1116_v17 = vpop.f32.mrf.mxu1 }
 0x21e   :  { %v990_v19 = vpack.c.bf16 %v722_v15, %v721_v14  ;;  %v720_v20 = vmax.f32 %v704_v16, 0.0  ;;  %v709_v23 = vadd.f32 %v1116_v17, %v883_v57 }
 0x21f   :  { %v610_v21 = vpop.f32.mrf.mxu1 }
 0x220   :  { %1021 = vst [vmem:[#allocation10 + $0x18] sm:$0xff] %v990_v19   ;;  %v985_v22 = vpack.c.bf16 %v720_v20, %v719_v18  ;;  %v707_v25 = vadd.f32 %v883_v57, %v610_v21  ;;  %v725_v28 = vmax.f32 %v709_v23, 0.0 }
 0x221   :  { %v1117_v24 = vpop.f32.mrf.mxu1 }
 0x222   :  { %1020 = vst [vmem:[#allocation10 + $0x10] sm:$0xff] %v985_v22   ;;  %v710_v26 = vadd.f32 %v1117_v24, %v883_v57  ;;  %v723_v32 = vmax.f32 %v707_v25, 0.0 }
 0x223   :  { %v613_v27 = vpop.f32.mrf.mxu1 }
 0x224   :  { %v726_v29 = vmax.f32 %v710_v26, 0.0  ;;  %v708_v30 = vadd.f32 %v883_v57, %v613_v27 }
 0x225   :  { %v1120_v31 = vpop.f32.mrf.mxu1 }
 0x226   :  { %v1000_v33 = vpack.c.bf16 %v726_v29, %v725_v28  ;;  %v724_v34 = vmax.f32 %v708_v30, 0.0  ;;  %v713_v37 = vadd.f32 %v1120_v31, %v883_v57 }
 0x227   :  { %v626_v35 = vpop.f32.mrf.mxu1 }
 0x228   :  { %1023 = vst [vmem:[#allocation10 + $0x28] sm:$0xff] %v1000_v33   ;;  %v995_v36 = vpack.c.bf16 %v724_v34, %v723_v32  ;;  %v711_v39 = vadd.f32 %v883_v57, %v626_v35  ;;  %v729_v42 = vmax.f32 %v713_v37, 0.0 }
 0x229   :  { %v1121_v38 = vpop.f32.mrf.mxu1 }
 0x22a   :  { %1022 = vst [vmem:[#allocation10 + $0x20] sm:$0xff] %v995_v36   ;;  %v714_v40 = vadd.f32 %v1121_v38, %v883_v57  ;;  %v727_v45 = vmax.f32 %v711_v39, 0.0 }
 0x22b   :  { %v629_v41 = vpop.f32.mrf.mxu1 }
 0x22c   :  { %v730_v43 = vmax.f32 %v714_v40, 0.0  ;;  %v712_v44 = vadd.f32 %v883_v57, %v629_v41 }
 0x22e   :  { %v1010_v46 = vpack.c.bf16 %v730_v43, %v729_v42  ;;  %v728_v47 = vmax.f32 %v712_v44, 0.0 }
 0x230   :  { %1025 = vst [vmem:[#allocation10 + $0x38] sm:$0xff] %v1010_v46   ;;  %v1005_v48 = vpack.c.bf16 %v728_v47, %v727_v45 }
 0x232   :  { %1024 = vst [vmem:[#allocation10 + $0x30] sm:$0xff] %v1005_v48  }
 0x233   :  { %1231 = shalt.err (!%p1228_p5)
}
 0x234   :  { %822 = dma.vmem_to_hbm [thread:$0]  %s817_s5, 1024, %s1308_s4, [#allocation6], %s1248_s20, %s1248_s20, %s1249_s21  }
 0x235   :  { %1244 = dma.done.wait [#allocation6], 1024  }
 0x236   :  { %1245 = vsyncadd [#allocation6], 4294966272 }
 0x237   :  { %826 = vsyncpa [#allocation5], 1 }
 0x238   :  { %827 = vsyncpa [#allocation8], 1 }
 0x239   :  { %828 = vsyncpa [#allocation6], 1 }

</bundles_post_ra>
